<compile_context>
chip_gen: v5e
topology: v5e:2x2
jax: 0.10.0
libtpu: 0.0.40
codegen_flags: <defaults>
</compile_context>

<pallas_src>
import jax
import jax.numpy as jnp
from jax.experimental import pallas as pl
from jax.experimental.pallas import tpu as pltpu

ROW_ALIGN = 16  # bf16 sublane packing granularity on the batch (row) axis


def _round_up(x, m):
    return (x + m - 1) // m * m


def mlp_kernel(x_ref, w1_ref, b1_ref, w2_ref, b2_ref, w3_ref, b3_ref, o_ref):
    # fc1 + ReLU: x arrives f32, cast to bf16 on the VPU (free slot) -> MXU, f32 acc.
    x_bf = x_ref[...].astype(jnp.bfloat16)
    h1 = jnp.dot(x_bf, w1_ref[...], preferred_element_type=jnp.float32)
    h1 = jnp.maximum(h1 + b1_ref[...], 0.0)
    # fc2 + ReLU
    h2 = jnp.dot(h1.astype(jnp.bfloat16), w2_ref[...],
                 preferred_element_type=jnp.float32)
    h2 = jnp.maximum(h2 + b2_ref[...], 0.0)
    # fc3 (logits) in f32 — memory-bound kernel, so f32 here is essentially free
    # and keeps logits close to the PyTorch f32 reference.
    out = jnp.dot(h2, w3_ref[...], preferred_element_type=jnp.float32) + b3_ref[...]
    o_ref[...] = out.astype(o_ref.dtype)


def hand_gesture_forward(x, params, *, tile_b=4096):
    """x: (B, input_size) float32; params: dict of w1,b1,w2,b2,w3,b3 (f32).

    Returns (B, num_classes) float32 logits.
    """
    w1, b1, w2, b2, w3, b3 = (
        params["w1"], params["b1"], params["w2"],
        params["b2"], params["w3"], params["b3"],
    )
    B, in_features = x.shape
    h1_dim = w1.shape[1]          # 128
    h2_dim = w2.shape[1]          # 64
    num_classes = w3.shape[1]     # e.g. 10

    # --- Adaptive batch tiling: pick the number of grid steps first, then size the
    # tile so padding waste is at most ROW_ALIGN-1 rows per step.  At large batch,
    # force >= 2 steps so the "parallel" grid axis can shard across v7x's 2 cores.
    n_steps = max(1, -(-B // tile_b))
    if B >= 2048 and n_steps < 2:
        n_steps = 2
    tile = _round_up(-(-B // n_steps), ROW_ALIGN)
    b_pad = tile * n_steps
    if b_pad != B:
        x = jnp.pad(x, ((0, b_pad - B), (0, 0)))

    # bf16 weights for fc1/fc2 (tiny, cast once in the wrapper); fc3 stays f32.
    w1_bf = w1.astype(jnp.bfloat16)
    w2_bf = w2.astype(jnp.bfloat16)
    w3_f = w3.astype(jnp.float32)
    b1_f = b1.astype(jnp.float32)
    b2_f = b2.astype(jnp.float32)
    b3_f = b3.astype(jnp.float32)

    grid = (n_steps,)

    def resident(shape):
        # Constant block index for every grid step -> fetched once, stays in VMEM.
        return pl.BlockSpec(shape, lambda i: (0, 0))

    flops = 2 * b_pad * (in_features * h1_dim + h1_dim * h2_dim + h2_dim * num_classes)
    bytes_accessed = (
        b_pad * in_features * 4                                   # x (f32 in)
        + (in_features * h1_dim + h1_dim * h2_dim) * 2            # w1,w2 (bf16)
        + h2_dim * num_classes * 4                                # w3 (f32)
        + (h1_dim + h2_dim + num_classes) * 4                     # biases (f32)
        + b_pad * num_classes * 4                                 # out (f32)
    )

    out = pl.pallas_call(
        mlp_kernel,
        out_shape=jax.ShapeDtypeStruct((b_pad, num_classes), jnp.float32),
        grid=grid,
        in_specs=[
            pl.BlockSpec((tile, in_features), lambda i: (i, 0)),  # x tile (pipelined)
            resident((in_features, h1_dim)),
            resident((1, h1_dim)),
            resident((h1_dim, h2_dim)),
            resident((1, h2_dim)),
            resident((h2_dim, num_classes)),
            resident((1, num_classes)),
        ],
        out_specs=pl.BlockSpec((tile, num_classes), lambda i: (i, 0)),
        compiler_params=pltpu.CompilerParams(
            dimension_semantics=("parallel",),
            # Large tiles (f32 x double-buffered + f32 intermediates) exceed the
            # v5e 16 MiB scoped default; 64 MiB fits every generation's physical VMEM.
            vmem_limit_bytes=64 * 1024 * 1024,
        ),
        cost_estimate=pl.CostEstimate(
            flops=flops, transcendentals=0, bytes_accessed=bytes_accessed),
    )(x, w1_bf, b1_f, w2_bf, b2_f, w3_f, b3_f)

    if b_pad != B:
        out = out[:B]
    return out


def init_params(key, input_size, num_classes):
    """Deterministic init mimicking PyTorch nn.Linear default U(-1/sqrt(fan_in), +1/sqrt(fan_in))."""
    def linear(k, fan_in, fan_out):
        kw, kb = jax.random.split(k)
        bound = 1.0 / jnp.sqrt(jnp.float32(fan_in))
        w = jax.random.uniform(kw, (fan_in, fan_out), jnp.float32, -bound, bound)
        b = jax.random.uniform(kb, (1, fan_out), jnp.float32, -bound, bound)
        return w, b

    k1, k2, k3 = jax.random.split(key, 3)
    w1, b1 = linear(k1, input_size, 128)
    w2, b2 = linear(k2, 128, 64)
    w3, b3 = linear(k3, 64, num_classes)
    return {"w1": w1, "b1": b1, "w2": w2, "b2": b2, "w3": w3, "b3": b3}


if __name__ == "__main__":
    key = jax.random.PRNGKey(0)
    k_params, k_x = jax.random.split(key)

    batch = 8
    input_size = 64   # flattened hand-landmark features
    num_classes = 10

    params = init_params(k_params, input_size, num_classes)
    x = jax.random.normal(k_x, (batch, input_size), jnp.float32)

    out = jax.block_until_ready(hand_gesture_forward(x, params))

    # Pure-JAX f32 reference. fc1/fc2 run bf16 operands on the MXU (f32 accumulate),
    # fc3 runs in f32, so tolerance is modest.
    h1 = jnp.maximum(x @ params["w1"] + params["b1"], 0.0)
    h2 = jnp.maximum(h1 @ params["w2"] + params["b2"], 0.0)
    ref = h2 @ params["w3"] + params["b3"]

    assert out.shape == (batch, num_classes)
    assert jnp.allclose(out, ref, atol=3e-2, rtol=3e-2), float(jnp.max(jnp.abs(out - ref)))

    print("KERNEL_OK")
</pallas_src>

<mosaic_0001>
module attributes {stable_mosaic.version = 11 : i64} {
  func.func @mlp_kernel(%arg0: i32, %arg1: memref<16x64xf32, #tpu.memory_space<vmem>>, %arg2: memref<64x128xbf16, #tpu.memory_space<vmem>>, %arg3: memref<1x128xf32, #tpu.memory_space<vmem>>, %arg4: memref<128x64xbf16, #tpu.memory_space<vmem>>, %arg5: memref<1x64xf32, #tpu.memory_space<vmem>>, %arg6: memref<64x10xf32, #tpu.memory_space<vmem>>, %arg7: memref<1x10xf32, #tpu.memory_space<vmem>>, %arg8: memref<16x10xf32, #tpu.memory_space<vmem>>) attributes {dimension_semantics = [#tpu.dimension_semantics<parallel>], iteration_bounds = array<i64: 1>, scalar_prefetch = 0 : i64, scratch_operands = 0 : i64, tpu.core_type = #tpu.core_type<tc>, window_params = [{transform_indices = @transform_0, window_bounds = array<i64: 16, 64>}, {pipeline_mode = #tpu.pipeline_mode<synchronous>, transform_indices = @transform_1, window_bounds = array<i64: 64, 128>}, {pipeline_mode = #tpu.pipeline_mode<synchronous>, transform_indices = @transform_2, window_bounds = array<i64: 1, 128>}, {pipeline_mode = #tpu.pipeline_mode<synchronous>, transform_indices = @transform_3, window_bounds = array<i64: 128, 64>}, {pipeline_mode = #tpu.pipeline_mode<synchronous>, transform_indices = @transform_4, window_bounds = array<i64: 1, 64>}, {pipeline_mode = #tpu.pipeline_mode<synchronous>, transform_indices = @transform_5, window_bounds = array<i64: 64, 10>}, {pipeline_mode = #tpu.pipeline_mode<synchronous>, transform_indices = @transform_6, window_bounds = array<i64: 1, 10>}, {transform_indices = @transform_7, window_bounds = array<i64: 16, 10>}]} {
    %c0 = arith.constant 0 : index
    %c0_0 = arith.constant 0 : index
    %0 = vector.load %arg1[%c0, %c0_0] : memref<16x64xf32, #tpu.memory_space<vmem>>, vector<16x64xf32>
    %1 = arith.truncf %0 : vector<16x64xf32> to vector<16x64xbf16>
    %c0_1 = arith.constant 0 : index
    %c0_2 = arith.constant 0 : index
    %2 = vector.load %arg2[%c0_1, %c0_2] : memref<64x128xbf16, #tpu.memory_space<vmem>>, vector<64x128xbf16>
    %cst = arith.constant dense<0.000000e+00> : vector<16x128xf32>
    %3 = tpu.matmul %1, %2, %cst {dimension_numbers = #tpu.dot_dimension_numbers<[1], [0], [0], [1], [0, 0, 1, 1], [], []>} : vector<16x64xbf16>, vector<64x128xbf16>, vector<16x128xf32> -> vector<16x128xf32>
    %c0_3 = arith.constant 0 : index
    %c0_4 = arith.constant 0 : index
    %4 = vector.load %arg3[%c0_3, %c0_4] : memref<1x128xf32, #tpu.memory_space<vmem>>, vector<1x128xf32>
    %5 = vector.broadcast %4 : vector<1x128xf32> to vector<16x128xf32>
    %6 = arith.addf %3, %5 : vector<16x128xf32>
    %cst_5 = arith.constant 0.000000e+00 : f32
    %7 = vector.broadcast %cst_5 : f32 to vector<16x128xf32>
    %8 = arith.maximumf %6, %7 : vector<16x128xf32>
    %9 = arith.truncf %8 : vector<16x128xf32> to vector<16x128xbf16>
    %c0_6 = arith.constant 0 : index
    %c0_7 = arith.constant 0 : index
    %10 = vector.load %arg4[%c0_6, %c0_7] : memref<128x64xbf16, #tpu.memory_space<vmem>>, vector<128x64xbf16>
    %cst_8 = arith.constant dense<0.000000e+00> : vector<16x64xf32>
    %11 = tpu.matmul %9, %10, %cst_8 {dimension_numbers = #tpu.dot_dimension_numbers<[1], [0], [0], [1], [0, 0, 1, 1], [], []>} : vector<16x128xbf16>, vector<128x64xbf16>, vector<16x64xf32> -> vector<16x64xf32>
    %c0_9 = arith.constant 0 : index
    %c0_10 = arith.constant 0 : index
    %12 = vector.load %arg5[%c0_9, %c0_10] : memref<1x64xf32, #tpu.memory_space<vmem>>, vector<1x64xf32>
    %13 = vector.broadcast %12 : vector<1x64xf32> to vector<16x64xf32>
    %14 = arith.addf %11, %13 : vector<16x64xf32>
    %cst_11 = arith.constant 0.000000e+00 : f32
    %15 = vector.broadcast %cst_11 : f32 to vector<16x64xf32>
    %16 = arith.maximumf %14, %15 : vector<16x64xf32>
    %c0_12 = arith.constant 0 : index
    %c0_13 = arith.constant 0 : index
    %17 = vector.load %arg6[%c0_12, %c0_13] : memref<64x10xf32, #tpu.memory_space<vmem>>, vector<64x10xf32>
    %cst_14 = arith.constant dense<0.000000e+00> : vector<16x10xf32>
    %18 = tpu.matmul %16, %17, %cst_14 {dimension_numbers = #tpu.dot_dimension_numbers<[1], [0], [0], [1], [0, 0, 1, 1], [], []>} : vector<16x64xf32>, vector<64x10xf32>, vector<16x10xf32> -> vector<16x10xf32>
    %c0_15 = arith.constant 0 : index
    %c0_16 = arith.constant 0 : index
    %19 = vector.load %arg7[%c0_15, %c0_16] : memref<1x10xf32, #tpu.memory_space<vmem>>, vector<1x10xf32>
    %20 = vector.broadcast %19 : vector<1x10xf32> to vector<16x10xf32>
    %21 = arith.addf %18, %20 : vector<16x10xf32>
    %c0_17 = arith.constant 0 : index
    %c0_18 = arith.constant 0 : index
    %22 = vector.load %arg8[%c0_17, %c0_18] : memref<16x10xf32, #tpu.memory_space<vmem>>, vector<16x10xf32>
    tpu.vector_store %arg8[%c0_17, %c0_18], %21 {strides = array<i32>} : memref<16x10xf32, #tpu.memory_space<vmem>>, vector<16x10xf32>,
    return
  }
  func.func @transform_0(%arg0: i32) -> (i32, i32) {
    %c0_i32 = arith.constant 0 : i32
    %c0_i32_0 = arith.constant 0 : i32
    return %arg0, %c0_i32 : i32, i32
  }
  func.func @transform_1(%arg0: i32) -> (i32, i32) {
    %c0_i32 = arith.constant 0 : i32
    %c0_i32_0 = arith.constant 0 : i32
    %c0_i32_1 = arith.constant 0 : i32
    return %c0_i32, %c0_i32_0 : i32, i32
  }
  func.func @transform_2(%arg0: i32) -> (i32, i32) {
    %c0_i32 = arith.constant 0 : i32
    %c0_i32_0 = arith.constant 0 : i32
    %c0_i32_1 = arith.constant 0 : i32
    return %c0_i32, %c0_i32_0 : i32, i32
  }
  func.func @transform_3(%arg0: i32) -> (i32, i32) {
    %c0_i32 = arith.constant 0 : i32
    %c0_i32_0 = arith.constant 0 : i32
    %c0_i32_1 = arith.constant 0 : i32
    return %c0_i32, %c0_i32_0 : i32, i32
  }
  func.func @transform_4(%arg0: i32) -> (i32, i32) {
    %c0_i32 = arith.constant 0 : i32
    %c0_i32_0 = arith.constant 0 : i32
    %c0_i32_1 = arith.constant 0 : i32
    return %c0_i32, %c0_i32_0 : i32, i32
  }
  func.func @transform_5(%arg0: i32) -> (i32, i32) {
    %c0_i32 = arith.constant 0 : i32
    %c0_i32_0 = arith.constant 0 : i32
    %c0_i32_1 = arith.constant 0 : i32
    return %c0_i32, %c0_i32_0 : i32, i32
  }
  func.func @transform_6(%arg0: i32) -> (i32, i32) {
    %c0_i32 = arith.constant 0 : i32
    %c0_i32_0 = arith.constant 0 : i32
    %c0_i32_1 = arith.constant 0 : i32
    return %c0_i32, %c0_i32_0 : i32, i32
  }
  func.func @transform_7(%arg0: i32) -> (i32, i32) {
    %c0_i32 = arith.constant 0 : i32
    %c0_i32_0 = arith.constant 0 : i32
    return %arg0, %c0_i32 : i32, i32
  }
}

</mosaic_0001>

<bundles_post_ra>
// kernel: tpu_custom_call.1
= control target key start
LH: loop header
LB: loop body
LE: loop exit
PB: predicated region body
PF: predicated region fallthrough
CT: control target
= control target key end

     0   :  { %s453_s0 = inlined_call_operand.vmem [shape: f32[16,64], index: 0, kind: input, shape index: {}]   ;;  %s454_s1 = inlined_call_operand.vmem [shape: bf16[64,128], index: 1, kind: input, shape index: {}]   ;;  %s455_s2 = inlined_call_operand.vmem [shape: f32[1,128], index: 2, kind: input, shape index: {}]   ;;  %s456_s3 = inlined_call_operand.vmem [shape: bf16[128,64], index: 3, kind: input, shape index: {}]   ;;  %s457_s4 = inlined_call_operand.vmem [shape: f32[1,64], index: 4, kind: input, shape index: {}]   ;;  %s458_s5 = inlined_call_operand.vmem [shape: f32[64,10], index: 5, kind: input, shape index: {}]   ;;  %s459_s6 = inlined_call_operand.vmem [shape: f32[1,10], index: 6, kind: input, shape index: {}]   ;;  %s460_s7 = inlined_call_operand.hbm [shape: f32[16,10], index: 7, kind: output, shape index: {}]  }
   0x1   :  { %v288_v0 = vld [vmem:[%s454_s1 + $0x18] sm:$0xff]  ;;  %v287_v1 = vld [vmem:[%s454_s1 + $0x10] sm:$0xff] }
   0x2   :  { %75 = vmatpush.bf16.msra.mxu0 %v288_v0  ;;  %v296_v2 = vld [vmem:[%s456_s3 + $0x38] sm:$0xff]  ;;  %v295_v3 = vld [vmem:[%s456_s3 + $0x30] sm:$0xff] }
   0x3   :  { %156 = vmatpush.bf16.msra.mxu1 %v296_v2 }
   0x4   :  { %12 = vsyncpa [#allocation3], 0  ;;  %v286_v4 = vld [vmem:[%s454_s1 + $0x8] sm:$0xff]  ;;  %v285_v6 = vld [vmem:[%s454_s1] sm:$0xff]  ;;  %vm67_vm0 = vcmask 523264   ;;  %vm213_vm1 = vcmask 80896  }
   0x5   :  { %v294_v5 = vld [vmem:[%s456_s3 + $0x28] sm:$0xff]  ;;  %v28_v7 = vld [vmem:[%s453_s0] sm:$0xff]  ;;  %v292_v11 = vld [vmem:[%s456_s3 + $0x18] sm:$0xff]  ;;  %s222_s24 = sshll.u32 %s460_s7, 4  ;;  %s330_s25 = smov 128   ;;  %s223_s24 = int_to_ptr.hbm [resolvable:$true] %s222_s24 }
   0x6   :  { %76 = vmatpush.bf16.msra.mxu0 %v287_v1  ;;  %v29_v8 = vld [vmem:[%s453_s0 + $0x8] sm:$0xff]  ;;  %v293_v9 = vld [vmem:[%s456_s3 + $0x20] sm:$0xff]  ;;  %v291_v12 = vld [vmem:[%s456_s3 + $0x10] sm:$0xff]  ;;  %s331_s26 = smov 8  }
   0x7   :  { %157 = vmatpush.bf16.msra.mxu1 %v295_v3  ;;  %v30_v10 = vpack.c.bf16 %v29_v8, %v28_v7  ;;  %v290_v13 = vld [vmem:[%s456_s3 + $0x8] sm:$0xff]  ;;  %v289_v14 = vld [vmem:[%s456_s3] sm:$0xff]  ;;  %v179_v15 = vld [vmem:[%s458_s5 + $0x38] sm:$0xff] }
   0x8   :  { %v178_v16 = vld [vmem:[%s458_s5 + $0x30] sm:$0xff]  ;;  %198 = vmatpush.msra.mxu2 %v179_v15  ;;  %v177_v17 = vld [vmem:[%s458_s5 + $0x28] sm:$0xff]  ;;  %v176_v18 = vld [vmem:[%s458_s5 + $0x20] sm:$0xff] }
   0x9   :  { %v175_v19 = vld [vmem:[%s458_s5 + $0x18] sm:$0xff]  ;;  %v300_v21 = vld [vmem:[%s455_s2] ss:$0 sm:$0xff]  ;;  %v174_v28 = vld [vmem:[%s458_s5 + $0x10] sm:$0xff] }
   0xa   :  { %77 = vmatpush.bf16.msra.mxu0 %v286_v4  ;;  %199 = vmatpush.msra.mxu2 %v178_v16  ;;  %v173_v29 = vld [vmem:[%s458_s5 + $0x8] sm:$0xff]  ;;  %v172_v30 = vld [vmem:[%s458_s5] sm:$0xff]  ;;  %s329_s5 = smov [#allocation2]  }
   0xb   :  { %158 = vmatpush.bf16.msra.mxu1 %v294_v5  ;;  %v301_v31 = vld [vmem:[%s457_s4] ss:$0 sm:$0xff]  ;;  %s220_s4 = sshll.u32 %s329_s5, 4  ;;  %s221_s4 = int_to_ptr.vmem [resolvable:$true] %s220_s4 }
   0xc   :  { %200 = vmatpush.msra.mxu2 %v177_v17  ;;  %v302_v38 = vld [vmem:[%s459_s6] ss:$0 sm:$0xff] }
   0xe   :  { %78 = vmatpush.bf16.msra.mxu0 %v285_v6  ;;  %201 = vmatpush.msra.mxu2 %v176_v18 }
   0xf   :  { %159 = vmatpush.bf16.msra.mxu1 %v293_v9 }
  0x10   :  { %202 = vmatpush.msra.mxu2 %v175_v19 }
  0x11   :  { %250 = vmatmul.msk.bf16.vlgmr.msra.gmra.mxu0 %vm67_vm0, %v30_v10 }
  0x12   :  { %203 = vmatpush.msra.mxu2 %v174_v28 }
  0x13   :  { %160 = vmatpush.bf16.msra.mxu1 %v292_v11 }
  0x14   :  { %204 = vmatpush.msra.mxu2 %v173_v29 }
  0x16   :  { %205 = vmatpush.msra.mxu2 %v172_v30 }
  0x17   :  { %161 = vmatpush.bf16.msra.mxu1 %v291_v12 }
  0x1b   :  { %162 = vmatpush.bf16.msra.mxu1 %v290_v13 }
  0x1f   :  { %163 = vmatpush.bf16.msra.mxu1 %v289_v14 }
  0x8e   :  { %v80_v20 = vpop.f32.mrf.mxu0 }
  0x8f   :  { %v81_v22 = vadd.f32 %v300_v21, %v80_v20 }
  0x91   :  { %v85_v25 = vmax.f32 %v81_v22, 0.0 }
  0x96   :  { %v82_v23 = vpop.f32.mrf.mxu0 }
  0x97   :  { %v83_v24 = vadd.f32 %v300_v21, %v82_v23 }
  0x99   :  { %v86_v26 = vmax.f32 %v83_v24, 0.0 }
  0x9b   :  { %v87_v27 = vpack.c.bf16 %v86_v26, %v85_v25 }
  0x9d   :  { %164 = vmatmul.bf16.vlgmr.msra.gmra.mxu1 %v87_v27 }
 0x11a   :  { %v165_v32 = vpop.f32.mrf.mxu1 }
 0x11b   :  { %v166_v33 = vadd.f32 %v301_v31, %v165_v32 }
 0x11d   :  { %v170_v34 = vmax.f32 %v166_v33, 0.0 }
 0x11f   :  { %283 = vmatmul.msk.f32.vlgmr.msra.gmra.mxu2 %vm67_vm0, %v170_v34 }
 0x122   :  { %v167_v35 = vpop.f32.mrf.mxu1 }
 0x123   :  { %v168_v36 = vadd.f32 %v301_v31, %v167_v35 }
 0x125   :  { %v171_v37 = vmax.f32 %v168_v36, 0.0 }
 0x127   :  { %284 = vmatmul.msk.f32.gmra.mxu2 %vm67_vm0, %v171_v37 }
 0x1a2   :  { %v207_v39 = vpop.f32.mrf.mxu2 }
 0x1a3   :  { %v208_v40 = vadd.f32 %v302_v38, %v207_v39 }
 0x1a5   :  { %214 = vst.msk [vmem:[#allocation2] sm:$0xff] %vm213_vm1, %v208_v40 }
 0x1aa   :  { %v210_v41 = vpop.f32.mrf.mxu2 }
 0x1ab   :  { %v211_v42 = vadd.f32 %v302_v38, %v210_v41 }
 0x1ad   :  { %215 = vst.msk [vmem:[#allocation2 + $0x8] sm:$0xff] %vm213_vm1, %v211_v42 }
 0x1ae   :  { %228 = dma.vmem_to_hbm [thread:$0]  %s221_s4, 256, %s223_s24, [#allocation3], %s330_s25, %s330_s25, %s331_s26  }
 0x1af   :  { %327 = dma.done.wait [#allocation3], 256  }
 0x1b0   :  { %328 = vsyncadd [#allocation3], 4294967040 }
 0x1b1   :  { %233 = vsyncpa [#allocation3], 1 }

</bundles_post_ra>
